<compile_context>
chip_gen: v5e
topology: v5e:2x2
jax: 0.10.0
libtpu: 0.0.40
codegen_flags: <defaults>
</compile_context>

<pallas_src>
import functools
import math

import jax
import jax.numpy as jnp
import numpy as np
from jax import lax
from jax.experimental import pallas as pl
from jax.experimental.pallas import tpu as pltpu


# ---------------------------------------------------------------------------
# Linear kernel: y = x @ W_t + b   (W_t is (in_features, out_features))
# ---------------------------------------------------------------------------
def _linear_kernel(x_ref, w_ref, b_ref, o_ref):
    y = jnp.dot(x_ref[...], w_ref[...], preferred_element_type=jnp.float32)
    y = y + b_ref[...].astype(jnp.float32)
    o_ref[...] = y.astype(o_ref.dtype)


def _linear(x, w, b, block_rows):
    """x: (rows, in_f); w: (out_f, in_f) [torch layout]; b: (out_f,)."""
    rows, in_f = x.shape
    out_f = w.shape[0]
    w_t = jnp.transpose(w)            # (in_f, out_f); one-time layout plumbing
    b2 = b.reshape(1, out_f)
    grid = (rows // block_rows,)
    return pl.pallas_call(
        _linear_kernel,
        out_shape=jax.ShapeDtypeStruct((rows, out_f), x.dtype),
        grid_spec=pltpu.PrefetchScalarGridSpec(
            num_scalar_prefetch=0,
            grid=grid,
            in_specs=[
                pl.BlockSpec((block_rows, in_f), lambda i: (i, 0)),
                pl.BlockSpec((in_f, out_f), lambda i: (0, 0)),   # weight stays resident
                pl.BlockSpec((1, out_f), lambda i: (0, 0)),
            ],
            out_specs=pl.BlockSpec((block_rows, out_f), lambda i: (i, 0)),
        ),
        compiler_params=pltpu.CompilerParams(
            dimension_semantics=("parallel",),
            vmem_limit_bytes=48 * 1024 * 1024,
        ),
    )(x, w_t, b2)


# ---------------------------------------------------------------------------
# Attention kernel (one head, one q-block per grid step)
# ---------------------------------------------------------------------------
def _attention_kernel(q_ref, k_ref, v_ref, cosq_ref, sinq_ref, cosk_ref,
                      sink_ref, rot_ref, segq_ref, segk_ref, o_ref,
                      krot_ref, *, scale, mask_min):
    # Rotary for K: compute once per head (first q-block of this head) and
    # keep it in VMEM scratch across the remaining q-blocks of the head.
    @pl.when(pl.program_id(1) == 0)
    def _():
        k32 = k_ref[...].astype(jnp.float32)
        k_half = jnp.dot(k32, rot_ref[...], preferred_element_type=jnp.float32)
        krot_ref[...] = k32 * cosk_ref[...] + k_half * sink_ref[...]

    in_dtype = q_ref.dtype

    # Rotary for Q (f32, then cast back to the input dtype like PyTorch).
    q32 = q_ref[...].astype(jnp.float32)
    q_half = jnp.dot(q32, rot_ref[...], preferred_element_type=jnp.float32)
    q = (q32 * cosq_ref[...] + q_half * sinq_ref[...]).astype(in_dtype)
    k = krot_ref[...].astype(in_dtype)

    # scores: (block_q, S) = q @ k^T / sqrt(head_dim) + mask
    s = lax.dot_general(q, k, (((1,), (1,)), ((), ())),
                        preferred_element_type=jnp.float32)
    s = s * scale
    same = segq_ref[...] == segk_ref[...]            # (block_q,1) == (1,S)
    s = s + jnp.where(same, 0.0, mask_min)

    # softmax in f32 (numerically-stable, as F.softmax does)
    m = jnp.max(s, axis=-1, keepdims=True)
    e = jnp.exp(s - m)
    p = (e / jnp.sum(e, axis=-1, keepdims=True)).astype(v_ref.dtype)

    o = jnp.dot(p, v_ref[...], preferred_element_type=jnp.float32)
    o_ref[...] = o.astype(o_ref.dtype)


# ---------------------------------------------------------------------------
# Full forward pass
# ---------------------------------------------------------------------------
def qwen2_5_vl_vision_attention(hidden_states, cu_seqlens, rotary_pos_emb,
                                qkv_w, qkv_b, proj_w, proj_b, num_heads):
    seq, dim = hidden_states.shape
    head_dim = dim // num_heads
    half = head_dim // 2
    dtype = hidden_states.dtype

    def _round_up(a, b):
        return (a + b - 1) // b * b

    # q-block: whole (8-aligned) sequence when small, else 128 rows.
    block_q = min(128, _round_up(seq, 8))
    s_pad = _round_up(seq, block_q)

    x = hidden_states
    if s_pad != seq:
        x = jnp.pad(x, ((0, s_pad - seq), (0, 0)))

    # ---- fused QKV projection -------------------------------------------
    qkv = _linear(x, qkv_w, qkv_b, block_rows=block_q)        # (s_pad, 3*dim)
    qkv = qkv.reshape(s_pad, 3, num_heads, head_dim)
    q = jnp.transpose(qkv[:, 0], (1, 0, 2))                   # (H, s_pad, D)
    k = jnp.transpose(qkv[:, 1], (1, 0, 2))
    v = jnp.transpose(qkv[:, 2], (1, 0, 2))

    # ---- rotary tables: cos/sin tiled [c, c] along head_dim (f32) --------
    freqs = rotary_pos_emb.astype(jnp.float32)                # (seq, D//2)
    cos = jnp.cos(freqs)
    sin = jnp.sin(freqs)
    cos = jnp.concatenate([cos, cos], axis=-1)                # (seq, D)
    sin = jnp.concatenate([sin, sin], axis=-1)
    if s_pad != seq:
        cos = jnp.pad(cos, ((0, s_pad - seq), (0, 0)))
        sin = jnp.pad(sin, ((0, s_pad - seq), (0, 0)))

    # rotate_half as an exact (+/-1) permutation matrix: (x @ R) == rotate_half(x)
    r = np.zeros((head_dim, head_dim), dtype=np.float32)
    r[np.arange(half) + half, np.arange(half)] = -1.0
    r[np.arange(half), np.arange(half) + half] = 1.0
    rot_mat = jnp.asarray(r)

    # ---- block-diagonal mask from cu_seqlens as segment ids ---------------
    # TODO(synk): assumes cu_seqlens[0] == 0 and cu_seqlens[-1] == seq (Qwen
    # invariant); positions outside every segment are not reproduced exactly.
    pos = jnp.arange(s_pad, dtype=jnp.int32)
    seg = jnp.sum(pos[:, None] >= cu_seqlens[None, 1:].astype(jnp.int32),
                  axis=-1).astype(jnp.int32)
    seg = jnp.where(pos < seq, seg, -1)        # padded rows isolated
    seg_q = seg.reshape(s_pad, 1)
    seg_k = seg.reshape(1, s_pad)

    scale = 1.0 / math.sqrt(head_dim)
    mask_min = float(jnp.finfo(dtype).min)

    grid = (num_heads, s_pad // block_q)
    ctx = pl.pallas_call(
        functools.partial(_attention_kernel, scale=scale, mask_min=mask_min),
        out_shape=jax.ShapeDtypeStruct((num_heads, s_pad, head_dim), dtype),
        grid_spec=pltpu.PrefetchScalarGridSpec(
            num_scalar_prefetch=0,
            grid=grid,
            in_specs=[
                pl.BlockSpec((None, block_q, head_dim), lambda h, i: (h, i, 0)),  # q
                pl.BlockSpec((None, s_pad, head_dim), lambda h, i: (h, 0, 0)),    # k
                pl.BlockSpec((None, s_pad, head_dim), lambda h, i: (h, 0, 0)),    # v
                pl.BlockSpec((block_q, head_dim), lambda h, i: (i, 0)),           # cos_q
                pl.BlockSpec((block_q, head_dim), lambda h, i: (i, 0)),           # sin_q
                pl.BlockSpec((s_pad, head_dim), lambda h, i: (0, 0)),             # cos_k
                pl.BlockSpec((s_pad, head_dim), lambda h, i: (0, 0)),             # sin_k
                pl.BlockSpec((head_dim, head_dim), lambda h, i: (0, 0)),          # rot
                pl.BlockSpec((block_q, 1), lambda h, i: (i, 0)),                  # seg_q
                pl.BlockSpec((1, s_pad), lambda h, i: (0, 0)),                    # seg_k
            ],
            out_specs=pl.BlockSpec((None, block_q, head_dim),
                                   lambda h, i: (h, i, 0)),
            scratch_shapes=[pltpu.VMEM((s_pad, head_dim), jnp.float32)],
        ),
        compiler_params=pltpu.CompilerParams(
            dimension_semantics=("parallel", "arbitrary"),
            vmem_limit_bytes=48 * 1024 * 1024,
        ),
    )(q, k, v, cos, sin, cos, sin, rot_mat, seg_q, seg_k)

    ctx = jnp.transpose(ctx, (1, 0, 2)).reshape(s_pad, dim)
    out = _linear(ctx, proj_w, proj_b, block_rows=block_q)
    return out[:seq]


# ---------------------------------------------------------------------------
# Pure-JAX reference (literal port of the PyTorch module)
# ---------------------------------------------------------------------------
def _reference(hidden_states, cu_seqlens, rotary_pos_emb,
               qkv_w, qkv_b, proj_w, proj_b, num_heads):
    seq, dim = hidden_states.shape
    head_dim = dim // num_heads
    half = head_dim // 2

    qkv = hidden_states @ qkv_w.T + qkv_b
    qkv = qkv.reshape(seq, 3, num_heads, head_dim)
    q, k, v = qkv[:, 0], qkv[:, 1], qkv[:, 2]           # (seq, H, D)

    freqs = rotary_pos_emb.astype(jnp.float32)
    cos = jnp.cos(freqs)
    sin = jnp.sin(freqs)
    cos = jnp.concatenate([cos, cos], axis=-1)[:, None, :]
    sin = jnp.concatenate([sin, sin], axis=-1)[:, None, :]

    def rope(t):
        t32 = t.astype(jnp.float32)
        t1, t2 = t32[..., :half], t32[..., half:]
        rot = jnp.concatenate([-t2, t1], axis=-1)
        return (t32 * cos + rot * sin).astype(t.dtype)

    q = rope(q)
    k = rope(k)

    mask = np.full((seq, seq), float(jnp.finfo(hidden_states.dtype).min),
                   dtype=np.float32)
    cs = np.asarray(cu_seqlens)
    for i in range(1, len(cs)):
        mask[cs[i - 1]:cs[i], cs[i - 1]:cs[i]] = 0.0
    mask = jnp.asarray(mask, dtype=hidden_states.dtype)

    q = jnp.transpose(q, (1, 0, 2))
    k = jnp.transpose(k, (1, 0, 2))
    v = jnp.transpose(v, (1, 0, 2))
    w = jnp.einsum("hqd,hkd->hqk", q, k) / math.sqrt(head_dim)
    w = w + mask[None]
    w = jax.nn.softmax(w.astype(jnp.float32), axis=-1).astype(q.dtype)
    o = jnp.einsum("hqk,hkd->hqd", w, v)
    o = jnp.transpose(o, (1, 0, 2)).reshape(seq, dim)
    return o @ proj_w.T + proj_b


if __name__ == "__main__":
    key = jax.random.PRNGKey(0)
    k1, k2, k3, k4, k5, k6 = jax.random.split(key, 6)

    seq, dim, num_heads = 8, 64, 4
    head_dim = dim // num_heads

    hidden_states = jax.random.normal(k1, (seq, dim), dtype=jnp.float32)
    rotary_pos_emb = jax.random.normal(k2, (seq, head_dim // 2),
                                       dtype=jnp.float32)
    qkv_w = jax.random.normal(k3, (3 * dim, dim), dtype=jnp.float32) * 0.05
    qkv_b = jax.random.normal(k4, (3 * dim,), dtype=jnp.float32) * 0.05
    proj_w = jax.random.normal(k5, (dim, dim), dtype=jnp.float32) * 0.05
    proj_b = jax.random.normal(k6, (dim,), dtype=jnp.float32) * 0.05
    cu_seqlens = jnp.array([0, 3, 8], dtype=jnp.int32)

    out = qwen2_5_vl_vision_attention(hidden_states, cu_seqlens,
                                      rotary_pos_emb, qkv_w, qkv_b,
                                      proj_w, proj_b, num_heads)
    out = jax.block_until_ready(out)

    ref = _reference(hidden_states, cu_seqlens, rotary_pos_emb,
                     qkv_w, qkv_b, proj_w, proj_b, num_heads)

    assert out.shape == (seq, dim)
    max_err = float(jnp.max(jnp.abs(out - ref)))
    assert jnp.allclose(out, ref, atol=1e-3, rtol=1e-3), max_err
    print("KERNEL_OK")
</pallas_src>

<mosaic_0001>
module attributes {stable_mosaic.version = 11 : i64} {
  func.func @_linear_kernel(%arg0: i32, %arg1: memref<8x64xf32, #tpu.memory_space<vmem>>, %arg2: memref<64x192xf32, #tpu.memory_space<vmem>>, %arg3: memref<1x192xf32, #tpu.memory_space<vmem>>, %arg4: memref<8x192xf32, #tpu.memory_space<vmem>>) attributes {dimension_semantics = [#tpu.dimension_semantics<parallel>], iteration_bounds = array<i64: 1>, scalar_prefetch = 0 : i64, scratch_operands = 0 : i64, tpu.core_type = #tpu.core_type<tc>, window_params = [{transform_indices = @transform_0, window_bounds = array<i64: 8, 64>}, {pipeline_mode = #tpu.pipeline_mode<synchronous>, transform_indices = @transform_1, window_bounds = array<i64: 64, 192>}, {pipeline_mode = #tpu.pipeline_mode<synchronous>, transform_indices = @transform_2, window_bounds = array<i64: 1, 192>}, {transform_indices = @transform_3, window_bounds = array<i64: 8, 192>}]} {
    %c0 = arith.constant 0 : index
    %c0_0 = arith.constant 0 : index
    %0 = vector.load %arg1[%c0, %c0_0] : memref<8x64xf32, #tpu.memory_space<vmem>>, vector<8x64xf32>
    %c0_1 = arith.constant 0 : index
    %c0_2 = arith.constant 0 : index
    %1 = vector.load %arg2[%c0_1, %c0_2] : memref<64x192xf32, #tpu.memory_space<vmem>>, vector<64x192xf32>
    %cst = arith.constant dense<0.000000e+00> : vector<8x192xf32>
    %2 = tpu.matmul %0, %1, %cst {dimension_numbers = #tpu.dot_dimension_numbers<[1], [0], [0], [1], [0, 0, 1, 1], [], []>} : vector<8x64xf32>, vector<64x192xf32>, vector<8x192xf32> -> vector<8x192xf32>
    %c0_3 = arith.constant 0 : index
    %c0_4 = arith.constant 0 : index
    %3 = vector.load %arg3[%c0_3, %c0_4] : memref<1x192xf32, #tpu.memory_space<vmem>>, vector<1x192xf32>
    %4 = vector.broadcast %3 : vector<1x192xf32> to vector<8x192xf32>
    %5 = arith.addf %2, %4 : vector<8x192xf32>
    %c0_5 = arith.constant 0 : index
    %c0_6 = arith.constant 0 : index
    %6 = vector.load %arg4[%c0_5, %c0_6] : memref<8x192xf32, #tpu.memory_space<vmem>>, vector<8x192xf32>
    tpu.vector_store %arg4[%c0_5, %c0_6], %5 {strides = array<i32>} : memref<8x192xf32, #tpu.memory_space<vmem>>, vector<8x192xf32>,
    return
  }
  func.func @transform_0(%arg0: i32) -> (i32, i32) {
    %c0_i32 = arith.constant 0 : i32
    %c0_i32_0 = arith.constant 0 : i32
    return %arg0, %c0_i32 : i32, i32
  }
  func.func @transform_1(%arg0: i32) -> (i32, i32) {
    %c0_i32 = arith.constant 0 : i32
    %c0_i32_0 = arith.constant 0 : i32
    %c0_i32_1 = arith.constant 0 : i32
    return %c0_i32, %c0_i32_0 : i32, i32
  }
  func.func @transform_2(%arg0: i32) -> (i32, i32) {
    %c0_i32 = arith.constant 0 : i32
    %c0_i32_0 = arith.constant 0 : i32
    %c0_i32_1 = arith.constant 0 : i32
    return %c0_i32, %c0_i32_0 : i32, i32
  }
  func.func @transform_3(%arg0: i32) -> (i32, i32) {
    %c0_i32 = arith.constant 0 : i32
    %c0_i32_0 = arith.constant 0 : i32
    return %arg0, %c0_i32 : i32, i32
  }
}

</mosaic_0001>

<bundles_post_ra>
// kernel: tpu_custom_call.1
= control target key start
LH: loop header
LB: loop body
LE: loop exit
PB: predicated region body
PF: predicated region fallthrough
CT: control target
= control target key end

     0   :  { %8 = vsyncpa [#allocation3], 0  ;;  %s296_s0 = inlined_call_operand.hbm [shape: f32[8,64], index: 0, kind: input, shape index: {}]   ;;  %s297_s1 = inlined_call_operand.hbm [shape: f32[64,192], index: 1, kind: input, shape index: {}]   ;;  %s298_s2 = inlined_call_operand.hbm [shape: f32[1,192], index: 2, kind: input, shape index: {}]   ;;  %s299_s3 = inlined_call_operand.hbm [shape: f32[8,192], index: 3, kind: output, shape index: {}]  }
   0x1   :  { %9 = vsyncpa [#allocation6], 0  ;;  %s26_s14 = sshll.u32 %s297_s1, 4  ;;  %s27_s14 = int_to_ptr.hbm [resolvable:$true] %s26_s14 }
   0x2   :  { %10 = vsyncpa [#allocation4], 0  ;;  %s255_s15 = smov [#allocation5]   ;;  %s16_s19 = sshll.u32 %s296_s0, 4  ;;  %s17_s19 = int_to_ptr.hbm [resolvable:$true] %s16_s19 }
   0x3   :  { %s28_s16 = sshll.u32 %s255_s15, 4  ;;  %s256_s20 = smov 256   ;;  %s29_s16 = int_to_ptr.vmem [resolvable:$true] %s28_s16 }
   0x4   :  { %s257_s21 = smov 16   ;;  %s258_s22 = smov [#allocation2]  }
   0x5   :  { %34 = dma.hbm_to_vmem [thread:$0]  %s27_s14, 2048, %s29_s16, [#allocation6], %s256_s20, %s256_s20, %s257_s21  }
   0x6   :  { %s18_s23 = sshll.u32 %s258_s22, 4  ;;  %s40_s26 = sshll.u32 %s298_s2, 4  ;;  %s19_s23 = int_to_ptr.vmem [resolvable:$true] %s18_s23  ;;  %s41_s26 = int_to_ptr.hbm [resolvable:$true] %s40_s26 }
   0x7   :  { %21 = dma.hbm_to_vmem [thread:$0]  %s17_s19, 128, %s19_s23, [#allocation3]  }
   0x8   :  { %s259_s1 = smov [#allocation7]  }
   0x9   :  { %s42_s27 = sshll.u32 %s259_s1, 4  ;;  %s43_s27 = int_to_ptr.vmem [resolvable:$true] %s42_s27 }
   0xa   :  { %45 = dma.hbm_to_vmem [thread:$0]  %s41_s26, 32, %s43_s27, [#allocation6]  }
   0xb   :  { %249 = dma.done.wait [#allocation3], 128  }
   0xc   :  { %250 = vsyncadd [#allocation3], 4294967168 }
   0xd   :  { %251 = dma.done.wait [#allocation6], 2080  }
   0xe   :  { %252 = vsyncadd [#allocation6], 4294965216  ;;  %v73_v0 = vld [vmem:[#allocation5 + $0x70] sm:$0xff]  ;;  %v74_v1 = vld [vmem:[#allocation5 + $0x78] sm:$0xff]  ;;  %vm81_vm0 = vcmask 523264   ;;  %s260_s0 = smov [#allocation8]  }
   0xf   :  { %v71_v2 = vld [vmem:[#allocation5 + $0x60] sm:$0xff]  ;;  %93 = vmatpush.msra.mxu0 %v73_v0  ;;  %113 = vmatpush.msra.mxu1 %v74_v1  ;;  %v72_v3 = vld [vmem:[#allocation5 + $0x68] sm:$0xff]  ;;  %v69_v4 = vld [vmem:[#allocation5 + $0x50] sm:$0xff]  ;;  %s132_s2 = sshll.u32 %s260_s0, 4  ;;  %s134_s30 = sshll.u32 %s299_s3, 4  ;;  %s133_s2 = int_to_ptr.vmem [resolvable:$true] %s132_s2  ;;  %s135_s30 = int_to_ptr.hbm [resolvable:$true] %s134_s30 }
  0x10   :  { %v70_v5 = vld [vmem:[#allocation5 + $0x58] sm:$0xff]  ;;  %v67_v6 = vld [vmem:[#allocation5 + $0x40] sm:$0xff]  ;;  %v68_v7 = vld [vmem:[#allocation5 + $0x48] sm:$0xff] }
  0x11   :  { %94 = vmatpush.msra.mxu0 %v71_v2  ;;  %114 = vmatpush.msra.mxu1 %v72_v3  ;;  %v65_v8 = vld [vmem:[#allocation5 + $0x30] sm:$0xff]  ;;  %v66_v9 = vld [vmem:[#allocation5 + $0x38] sm:$0xff]  ;;  %v63_v10 = vld [vmem:[#allocation5 + $0x20] sm:$0xff] }
  0x12   :  { %v64_v11 = vld [vmem:[#allocation5 + $0x28] sm:$0xff]  ;;  %v61_v12 = vld [vmem:[#allocation5 + $0x10] sm:$0xff]  ;;  %v62_v13 = vld [vmem:[#allocation5 + $0x18] sm:$0xff] }
  0x13   :  { %95 = vmatpush.msra.mxu0 %v69_v4  ;;  %115 = vmatpush.msra.mxu1 %v70_v5  ;;  %v59_v14 = vld [vmem:[#allocation5] sm:$0xff]  ;;  %v60_v15 = vld [vmem:[#allocation5 + $0x8] sm:$0xff]  ;;  %v58_v16 = vld [vmem:[#allocation2] sm:$0xff] }
  0x14   :  { %v75_v17 = vld [vmem:[#allocation7] sm:$0x3] }
  0x15   :  { %96 = vmatpush.msra.mxu0 %v67_v6  ;;  %116 = vmatpush.msra.mxu1 %v68_v7  ;;  %v77_v18 = vperm.slane %v75_v17, 0  ;;  %v78_v19 = vperm.slane %v75_v17, 1 }
  0x17   :  { %97 = vmatpush.msra.mxu0 %v65_v8  ;;  %117 = vmatpush.msra.mxu1 %v66_v9 }
  0x19   :  { %98 = vmatpush.msra.mxu0 %v63_v10  ;;  %118 = vmatpush.msra.mxu1 %v64_v11 }
  0x1b   :  { %99 = vmatpush.msra.mxu0 %v61_v12  ;;  %119 = vmatpush.msra.mxu1 %v62_v13 }
  0x1d   :  { %100 = vmatpush.msra.mxu0 %v59_v14  ;;  %120 = vmatpush.msra.mxu1 %v60_v15 }
  0x1e   :  { %145 = vmatmul.msk.f32.vlgmr.msra.gmra.mxu0 %vm81_vm0, %v58_v16  ;;  %146 = vmatmul.msk.f32.vlgmr.msra.gmra.mxu1 %vm81_vm0, %v58_v16 }
  0x9b   :  { %v102_v20 = vpop.f32.mrf.mxu0  ;;  %v122_v21 = vpop.f32.mrf.mxu1 }
  0x9c   :  { %v103_v22 = vadd.f32 %v102_v20, %v77_v18  ;;  %v123_v23 = vadd.f32 %v122_v21, %v78_v19 }
  0x9e   :  { %125 = vst [vmem:[#allocation8] sm:$0xff] %v103_v22 }
  0x9f   :  { %126 = vst.msk [vmem:[#allocation8 + $0x8] sm:$0xff] %vm81_vm0, %v123_v23 }
  0xa0   :  { %137 = dma.vmem_to_hbm [thread:$0]  %s133_s2, 256, %s135_s30, [#allocation4]  }
  0xa1   :  { %253 = dma.done.wait [#allocation4], 256  }
  0xa2   :  { %254 = vsyncadd [#allocation4], 4294967040 }
  0xa3   :  { %142 = vsyncpa [#allocation3], 1 }
  0xa4   :  { %143 = vsyncpa [#allocation6], 1 }
  0xa5   :  { %144 = vsyncpa [#allocation4], 1 }

</bundles_post_ra>
